<compile_context>
chip_gen: v6e
topology: v6e:2x2x1
jax: 0.10.0
libtpu: 0.0.40
codegen_flags: <defaults>
</compile_context>

<pallas_src>
import math

import jax
import jax.numpy as jnp
from jax.experimental import pallas as pl
from jax.experimental.pallas import tpu as pltpu

_LANES = 512            # lane-dense flat layout (multiple of 128)
_MAX_TILE_ROWS = 1024   # 1024 x 512 f32 = 2 MiB per 'hm' input tile
_SUB = 16               # sublane multiple for tiled (non-full) blocks (bf16-safe)

_EPS = 1e-4
_LOG_EPS = math.log(_EPS)
_FP_LOGIT = math.log(0.1 / 0.9)     # pred > 0.1  <=>  x > logit(0.1)


def _cdiv(a, b):
    return -(-a // b)


def _round_up(a, m):
    return _cdiv(a, m) * m


# ----------------------------------------------------------------------------
# Fused Pallas kernel: focal('hm') + focal('hm0') + fp('hm')
# ----------------------------------------------------------------------------
def _head_planes(x, g, inv_shrink):
    """Per-element combined focal-loss plane, positive-count plane and
    log(1-pred)*pred^2 (reused by the fp loss).  One exp + one log + one EUP
    reciprocal per element; masks as where-selects; one-sided log clips."""
    e = jnp.exp(-jnp.abs(x))
    denom = 1.0 + e
    inv_denom = pl.reciprocal(denom, approx=True)           # EUP slot, off the VALU
    sig = jnp.where(x >= 0.0, 1.0, e) * inv_denom
    pred = jnp.clip(sig, _EPS, 1.0 - _EPS)
    sp = jnp.maximum(x, 0.0) + jnp.log(denom)               # softplus(x)
    log_1mp = jnp.maximum(-sp, _LOG_EPS)                    # log(1-pred), lower clip only
    log_p = jnp.maximum(x - sp, _LOG_EPS)                   # log(pred),   lower clip only

    omp = 1.0 - pred
    pos_term = log_p * (omp * omp)
    omg = 1.0 - g
    omg2 = omg * omg
    neg_w = omg2 * omg2                                     # (1-g)^4
    if inv_shrink != 1.0:
        neg_w = neg_w * inv_shrink                          # shrink folded in-kernel
    neg_base = log_1mp * (pred * pred)
    neg_term = neg_base * neg_w
    # pos (g == 1) and neg (g < 1) are mutually exclusive; pad sentinel g=2 -> 0.
    loss = jnp.where(g == 1.0, pos_term, jnp.where(g < 1.0, neg_term, 0.0))
    npos = jnp.where(g == 1.0, 1.0, 0.0)
    return loss, npos, neg_base


def _accum(acc_ref, plane):
    """acc_ref (8, L) += sublane-folded `plane` (rows, L): vreg-aligned VPU adds
    only; no per-step cross-lane reduction."""
    rows, width = plane.shape
    main = (rows // 8) * 8
    if main == 8:
        acc_ref[...] += plane[:8, :]
    elif main > 8:
        acc_ref[...] += jnp.sum(plane[:main, :].reshape(main // 8, 8, width), axis=0)
    rem = rows - main
    if rem:
        acc_ref[0:rem, :] += plane[main:, :]


def _fused_kernel(x1_ref, g1_ref, x0_ref, g0_ref,
                  loss1_ref, np1_ref, loss0_ref, np0_ref, fpn_ref, fpc_ref,
                  a_loss1, a_np1, a_loss0, a_np0, a_fpn, a_fpc):
    t = pl.program_id(2)

    @pl.when(t == 0)
    def _init():
        for a in (a_loss1, a_np1, a_loss0, a_np0, a_fpn, a_fpc):
            a[...] = jnp.zeros_like(a)

    # ---- 'hm' head: focal loss (shrink=16) + false-positive loss (shares terms).
    x1 = x1_ref[...].astype(jnp.float32)
    g1 = g1_ref[...].astype(jnp.float32)
    loss1, np1, neg_base1 = _head_planes(x1, g1, 1.0 / 16.0)
    fp_mask = jnp.logical_and(g1 == 0.0, x1 > _FP_LOGIT)    # exact count (logit cmp)
    _accum(a_loss1, loss1)
    _accum(a_np1, np1)
    _accum(a_fpn, jnp.where(fp_mask, neg_base1, 0.0))
    _accum(a_fpc, jnp.where(fp_mask, 1.0, 0.0))

    # ---- 'hm0' head: focal loss only (shrink=1).
    x0 = x0_ref[...].astype(jnp.float32)
    g0 = g0_ref[...].astype(jnp.float32)
    loss0, np0, _ = _head_planes(x0, g0, 1.0)
    _accum(a_loss0, loss0)
    _accum(a_np0, np0)

    # ---- One cross-lane/sublane reduction per quantity, at the last step only.
    @pl.when(t == pl.num_programs(2) - 1)
    def _fin():
        loss1_ref[...] = jnp.sum(a_loss1[...]).reshape(1, 1, 1)
        np1_ref[...] = jnp.sum(a_np1[...]).reshape(1, 1, 1)
        loss0_ref[...] = jnp.sum(a_loss0[...]).reshape(1, 1, 1)
        np0_ref[...] = jnp.sum(a_np0[...]).reshape(1, 1, 1)
        fpn_ref[...] = jnp.sum(a_fpn[...]).reshape(1, 1, 1)
        fpc_ref[...] = jnp.sum(a_fpc[...]).reshape(1, 1, 1)


# ----------------------------------------------------------------------------
# Wrappers
# ----------------------------------------------------------------------------
def _choose_layout(n1, n0):
    """Copy-free tiling: returns (r1, r0, tr1, tr0, P, T) or None (ragged)."""
    if n1 % _LANES or n0 % _LANES:
        return None
    r1, r0 = n1 // _LANES, n0 // _LANES
    if r1 <= _MAX_TILE_ROWS:
        return r1, r0, r1, r0, 1, 1                 # single step, full-extent blocks
    t_min = _cdiv(r1, _MAX_TILE_ROWS)
    for t_tot in range(t_min, min(r1 // _SUB, 8 * t_min) + 1):
        if (r1 % t_tot == 0 and r0 % t_tot == 0
                and (r1 // t_tot) % _SUB == 0 and (r0 // t_tot) % _SUB == 0):
            p = 2 if t_tot % 2 == 0 else 1
            return r1, r0, r1 // t_tot, r0 // t_tot, p, t_tot // p
    return None


def _pack(arr, rows, pad_val):
    """(B, ...) -> (B, rows, _LANES), padded with `pad_val` (ragged fallback)."""
    b = arr.shape[0]
    flat = arr.reshape(b, -1)
    pad = rows * _LANES - flat.shape[1]
    if pad:
        flat = jnp.pad(flat, ((0, 0), (0, pad)), constant_values=pad_val)
    return flat.reshape(b, rows, _LANES)


def _fused_hm_hm0_fp(x_hm, gt_hm, x_h0, gt_h0):
    """Returns (loss_hm, loss_hm0_unweighted, fp_loss)."""
    B = x_hm.shape[0]
    n1 = x_hm.size // B
    n0 = x_h0.size // B

    layout = _choose_layout(n1, n0)
    if layout is not None:
        # Copy-free path: reshape only, no pad / astype HBM round-trip.
        r1, r0, tr1, tr0, P, T = layout
        x1 = x_hm.reshape(B, r1, _LANES)
        g1 = gt_hm.reshape(B, r1, _LANES)
        x0 = x_h0.reshape(B, r0, _LANES)
        g0 = gt_h0.reshape(B, r0, _LANES)
    else:
        # Ragged fallback: pad (gt sentinel 2.0 contributes exactly zero).
        t_tot = max(1, _cdiv(_cdiv(n1, _LANES), _MAX_TILE_ROWS))
        tr1 = _round_up(_cdiv(_cdiv(n1, _LANES), t_tot), _SUB)
        tr0 = _round_up(_cdiv(_cdiv(n0, _LANES), t_tot), _SUB)
        r1, r0 = t_tot * tr1, t_tot * tr0
        P = 2 if t_tot % 2 == 0 else 1
        T = t_tot // P
        x1 = _pack(x_hm, r1, 0.0)
        g1 = _pack(gt_hm, r1, 2.0)
        x0 = _pack(x_h0, r0, 0.0)
        g0 = _pack(gt_h0, r0, 2.0)

    in_specs = [
        pl.BlockSpec((None, tr1, _LANES), lambda b, p, t: (b, p * T + t, 0)),
        pl.BlockSpec((None, tr1, _LANES), lambda b, p, t: (b, p * T + t, 0)),
        pl.BlockSpec((None, tr0, _LANES), lambda b, p, t: (b, p * T + t, 0)),
        pl.BlockSpec((None, tr0, _LANES), lambda b, p, t: (b, p * T + t, 0)),
    ]
    out_spec = pl.BlockSpec((1, 1, 1), lambda b, p, t: (b, p, 0))
    out_shape = tuple(jax.ShapeDtypeStruct((B, P, 1), jnp.float32) for _ in range(6))

    (loss1_p, np1_p, loss0_p, np0_p, fpn_p, fpc_p) = pl.pallas_call(
        _fused_kernel,
        grid=(B, P, T),
        in_specs=in_specs,
        out_specs=(out_spec,) * 6,
        out_shape=out_shape,
        scratch_shapes=[pltpu.VMEM((8, _LANES), jnp.float32) for _ in range(6)],
        compiler_params=pltpu.CompilerParams(
            dimension_semantics=("parallel", "parallel", "arbitrary"),
            vmem_limit_bytes=32 * 1024 * 1024),
    )(x1, g1, x0, g0)

    loss1, np1 = jnp.sum(loss1_p), jnp.sum(np1_p)
    loss0, np0 = jnp.sum(loss0_p), jnp.sum(np0_p)
    loss_hm = jnp.where(np1 == 0.0, -loss1, -loss1 / jnp.maximum(np1, 1.0))
    loss_hm0 = jnp.where(np0 == 0.0, -loss0, -loss0 / jnp.maximum(np0, 1.0))

    fpn = jnp.sum(fpn_p, axis=(1, 2))          # per-batch numerator
    fpc = jnp.sum(fpc_p, axis=(1, 2))          # per-batch count
    fpc = jnp.where(fpc == 0.0, 1.0, fpc)
    fp_loss = -jnp.mean(fpn / fpc)
    return loss_hm, loss_hm0, fp_loss


def _neg_loss_jax(x, gt, shrink):
    """Plain-JAX focal loss for the tiny pyramid heads (hm1..hm4)."""
    pred = jnp.clip(jax.nn.sigmoid(x.astype(jnp.float32)), _EPS, 1.0 - _EPS)
    gt = gt.astype(jnp.float32)
    pos_inds = (gt == 1.0).astype(jnp.float32)
    neg_inds = (gt < 1.0).astype(jnp.float32)
    neg_w = (1.0 - gt) ** 4
    pos_loss = jnp.sum(jnp.log(pred) * (1.0 - pred) ** 2 * pos_inds)
    neg_loss = jnp.sum(jnp.log(1.0 - pred) * pred ** 2 * neg_w * neg_inds) / shrink
    npos = jnp.sum(pos_inds)
    return jnp.where(npos == 0.0, -neg_loss,
                     -(pos_loss + neg_loss) / jnp.maximum(npos, 1.0))


def _max_pool2d(x, k):
    # F.max_pool2d(x, k, k) on NCHW with H, W divisible by k.
    B, C, H, W = x.shape
    return x.reshape(B, C, H // k, k, W // k, k).max(axis=(3, 5))


def h_loc_loss(h_hm, hm_gt):
    """Forward pass of HLocLoss.

    h_hm  : dict of head -> raw logits (pre-sigmoid), NCHW
    hm_gt : (B, C, H, W) ground-truth heat map in [0, 1]
    """
    # Hierarchical GT pyramid (max-of-max == max over the larger window).
    h_hm_gt = {"hm": hm_gt}
    h_hm_gt["hm0"] = _max_pool2d(h_hm_gt["hm"], 2)
    h_hm_gt["hm1"] = _max_pool2d(h_hm_gt["hm0"], 2)
    h_hm_gt["hm2"] = _max_pool2d(h_hm_gt["hm1"], 2)
    h_hm_gt["hm3"] = _max_pool2d(h_hm_gt["hm2"], 2)
    h_hm_gt["hm4"] = _max_pool2d(h_hm_gt["hm3"], 2)

    # Fused Pallas kernel: 'hm' focal + fp, 'hm0' focal — single launch.
    loss_hm, loss_hm0, fp_loss = _fused_hm_hm0_fp(
        h_hm["hm"], h_hm_gt["hm"], h_hm["hm0"], h_hm_gt["hm0"])

    loc_loss = loss_hm + 0.1 * loss_hm0
    # Tiny heads in plain JAX (launch overhead exceeds their math).
    for head in h_hm:
        if head in ("hm", "hm0"):
            continue
        loc_loss = loc_loss + 0.1 * _neg_loss_jax(h_hm[head], h_hm_gt[head], 1.0)

    return loc_loss + fp_loss


# ----------------------------------------------------------------------------
# Pure-JAX reference (mirrors the PyTorch module) — used for a self-check.
# ----------------------------------------------------------------------------
def _reference(h_hm, hm_gt):
    def _sig(x):
        return jnp.clip(jax.nn.sigmoid(x), _EPS, 1.0 - _EPS)

    def _neg(pred, gt, shrink):
        pos_inds = (gt == 1.0).astype(jnp.float32)
        neg_inds = (gt < 1.0).astype(jnp.float32)
        neg_w = (1.0 - gt) ** 4
        pos_loss = jnp.sum(jnp.log(pred) * (1.0 - pred) ** 2 * pos_inds)
        neg_loss = jnp.sum(jnp.log(1.0 - pred) * pred ** 2 * neg_w * neg_inds / shrink)
        npos = jnp.sum(pos_inds)
        return jnp.where(npos == 0.0, -neg_loss,
                         -(pos_loss + neg_loss) / jnp.maximum(npos, 1.0))

    def _fp(pred, seg):
        neg_inds = (seg == 0.0).astype(jnp.float32)
        p = jnp.maximum(pred * neg_inds, _EPS)
        mask = (p > 0.1).astype(jnp.float32)
        nl = jnp.sum(jnp.log(1.0 - p) * p ** 2 * mask, axis=(1, 2, 3))
        nn = jnp.sum(mask, axis=(1, 2, 3))
        nn = jnp.where(nn == 0.0, 1.0, nn)
        return -jnp.mean(nl / nn)

    gts = {"hm": hm_gt, "hm0": _max_pool2d(hm_gt, 2), "hm1": _max_pool2d(hm_gt, 4),
           "hm2": _max_pool2d(hm_gt, 8), "hm3": _max_pool2d(hm_gt, 16),
           "hm4": _max_pool2d(hm_gt, 32)}
    loss = jnp.float32(0.0)
    for head in h_hm:
        if head == "hm":
            loss = loss + _neg(_sig(h_hm[head]), gts[head], 16.0)
        else:
            loss = loss + 0.1 * _neg(_sig(h_hm[head]), gts[head], 1.0)
    return loss + _fp(_sig(h_hm["hm"]), hm_gt)


# ----------------------------------------------------------------------------
# Example run
# ----------------------------------------------------------------------------
if __name__ == "__main__":
    key = jax.random.PRNGKey(0)
    B, C, H, W = 2, 1, 64, 64  # H, W must be divisible by 32 (pooling pyramid)

    head_shapes = {
        "hm": (H, W),
        "hm0": (H // 2, W // 2),
        "hm1": (H // 4, W // 4),
        "hm2": (H // 8, W // 8),
        "hm3": (H // 16, W // 16),
        "hm4": (H // 32, W // 32),
    }

    h_hm = {}
    for name, (h, w) in head_shapes.items():
        key, sub = jax.random.split(key)
        h_hm[name] = jax.random.normal(sub, (B, C, h, w), dtype=jnp.float32)

    key, sub = jax.random.split(key)
    u = jax.random.uniform(sub, (B, C, H, W), dtype=jnp.float32)
    hm_gt = jnp.where(u < 0.6, 0.0, u)        # many exact zeros (seg == 0)
    hm_gt = jnp.where(u > 0.98, 1.0, hm_gt)   # some exact ones (positives)

    loss = jax.jit(h_loc_loss)(h_hm, hm_gt)
    jax.block_until_ready(loss)

    ref = _reference(h_hm, hm_gt)
    jax.block_until_ready(ref)
    # rtol widened slightly: pl.reciprocal(approx=True) perturbs pred by ~2^-12
    # relative (smooth terms only; pos/fp counts stay exact via exact compares).
    if not bool(jnp.allclose(loss, ref, rtol=1e-3, atol=1e-5)):
        raise SystemExit(f"mismatch: pallas={float(loss)} ref={float(ref)}")

    print("KERNEL_OK")
</pallas_src>

<mosaic_0001>
module attributes {stable_mosaic.version = 11 : i64} {
  func.func @_fused_kernel(%arg0: i32, %arg1: i32, %arg2: i32, %arg3: memref<1x8x512xf32, #tpu.memory_space<vmem>>, %arg4: memref<1x8x512xf32, #tpu.memory_space<vmem>>, %arg5: memref<1x2x512xf32, #tpu.memory_space<vmem>>, %arg6: memref<1x2x512xf32, #tpu.memory_space<vmem>>, %arg7: memref<1x1x1xf32, #tpu.memory_space<vmem>>, %arg8: memref<1x1x1xf32, #tpu.memory_space<vmem>>, %arg9: memref<1x1x1xf32, #tpu.memory_space<vmem>>, %arg10: memref<1x1x1xf32, #tpu.memory_space<vmem>>, %arg11: memref<1x1x1xf32, #tpu.memory_space<vmem>>, %arg12: memref<1x1x1xf32, #tpu.memory_space<vmem>>, %arg13: memref<8x512xf32, #tpu.memory_space<vmem>>, %arg14: memref<8x512xf32, #tpu.memory_space<vmem>>, %arg15: memref<8x512xf32, #tpu.memory_space<vmem>>, %arg16: memref<8x512xf32, #tpu.memory_space<vmem>>, %arg17: memref<8x512xf32, #tpu.memory_space<vmem>>, %arg18: memref<8x512xf32, #tpu.memory_space<vmem>>) attributes {dimension_semantics = [#tpu.dimension_semantics<parallel>, #tpu.dimension_semantics<parallel>, #tpu.dimension_semantics<arbitrary>], iteration_bounds = array<i64: 2, 1, 1>, scalar_prefetch = 0 : i64, scratch_operands = 6 : i64, tpu.core_type = #tpu.core_type<tc>, window_params = [{transform_indices = @transform_0, window_bounds = array<i64: 1, 8, 512>}, {transform_indices = @transform_1, window_bounds = array<i64: 1, 8, 512>}, {transform_indices = @transform_2, window_bounds = array<i64: 1, 2, 512>}, {transform_indices = @transform_3, window_bounds = array<i64: 1, 2, 512>}, {transform_indices = @transform_4, window_bounds = array<i64: 1, 1, 1>}, {transform_indices = @transform_5, window_bounds = array<i64: 1, 1, 1>}, {transform_indices = @transform_6, window_bounds = array<i64: 1, 1, 1>}, {transform_indices = @transform_7, window_bounds = array<i64: 1, 1, 1>}, {transform_indices = @transform_8, window_bounds = array<i64: 1, 1, 1>}, {transform_indices = @transform_9, window_bounds = array<i64: 1, 1, 1>}]} {
    %c0_i32 = arith.constant 0 : i32
    %0 = arith.cmpi eq, %arg2, %c0_i32 : i32
    %1 = arith.extui %0 : i1 to i32
    %c0_i32_0 = arith.constant 0 : i32
    %2 = arith.cmpi ne, %1, %c0_i32_0 : i32
    scf.if %2 {
      %cst_79 = arith.constant 0.000000e+00 : f32
      %144 = vector.broadcast %cst_79 : f32 to vector<8x512xf32>
      %c0_80 = arith.constant 0 : index
      %c0_81 = arith.constant 0 : index
      %145 = vector.load %arg13[%c0_80, %c0_81] : memref<8x512xf32, #tpu.memory_space<vmem>>, vector<8x512xf32>
      tpu.vector_store %arg13[%c0_80, %c0_81], %144 {strides = array<i32>} : memref<8x512xf32, #tpu.memory_space<vmem>>, vector<8x512xf32>,
      %cst_82 = arith.constant 0.000000e+00 : f32
      %146 = vector.broadcast %cst_82 : f32 to vector<8x512xf32>
      %c0_83 = arith.constant 0 : index
      %c0_84 = arith.constant 0 : index
      %147 = vector.load %arg14[%c0_83, %c0_84] : memref<8x512xf32, #tpu.memory_space<vmem>>, vector<8x512xf32>
      tpu.vector_store %arg14[%c0_83, %c0_84], %146 {strides = array<i32>} : memref<8x512xf32, #tpu.memory_space<vmem>>, vector<8x512xf32>,
      %cst_85 = arith.constant 0.000000e+00 : f32
      %148 = vector.broadcast %cst_85 : f32 to vector<8x512xf32>
      %c0_86 = arith.constant 0 : index
      %c0_87 = arith.constant 0 : index
      %149 = vector.load %arg15[%c0_86, %c0_87] : memref<8x512xf32, #tpu.memory_space<vmem>>, vector<8x512xf32>
      tpu.vector_store %arg15[%c0_86, %c0_87], %148 {strides = array<i32>} : memref<8x512xf32, #tpu.memory_space<vmem>>, vector<8x512xf32>,
      %cst_88 = arith.constant 0.000000e+00 : f32
      %150 = vector.broadcast %cst_88 : f32 to vector<8x512xf32>
      %c0_89 = arith.constant 0 : index
      %c0_90 = arith.constant 0 : index
      %151 = vector.load %arg16[%c0_89, %c0_90] : memref<8x512xf32, #tpu.memory_space<vmem>>, vector<8x512xf32>
      tpu.vector_store %arg16[%c0_89, %c0_90], %150 {strides = array<i32>} : memref<8x512xf32, #tpu.memory_space<vmem>>, vector<8x512xf32>,
      %cst_91 = arith.constant 0.000000e+00 : f32
      %152 = vector.broadcast %cst_91 : f32 to vector<8x512xf32>
      %c0_92 = arith.constant 0 : index
      %c0_93 = arith.constant 0 : index
      %153 = vector.load %arg17[%c0_92, %c0_93] : memref<8x512xf32, #tpu.memory_space<vmem>>, vector<8x512xf32>
      tpu.vector_store %arg17[%c0_92, %c0_93], %152 {strides = array<i32>} : memref<8x512xf32, #tpu.memory_space<vmem>>, vector<8x512xf32>,
      %cst_94 = arith.constant 0.000000e+00 : f32
      %154 = vector.broadcast %cst_94 : f32 to vector<8x512xf32>
      %c0_95 = arith.constant 0 : index
      %c0_96 = arith.constant 0 : index
      %155 = vector.load %arg18[%c0_95, %c0_96] : memref<8x512xf32, #tpu.memory_space<vmem>>, vector<8x512xf32>
      tpu.vector_store %arg18[%c0_95, %c0_96], %154 {strides = array<i32>} : memref<8x512xf32, #tpu.memory_space<vmem>>, vector<8x512xf32>,
    } else {
    }
    %c0 = arith.constant 0 : index
    %c0_1 = arith.constant 0 : index
    %c0_2 = arith.constant 0 : index
    %3 = vector.load %arg3[%c0, %c0_1, %c0_2] : memref<1x8x512xf32, #tpu.memory_space<vmem>>, vector<1x8x512xf32>
    %4 = vector.shape_cast %3 : vector<1x8x512xf32> to vector<8x512xf32>
    %c0_3 = arith.constant 0 : index
    %c0_4 = arith.constant 0 : index
    %c0_5 = arith.constant 0 : index
    %5 = vector.load %arg4[%c0_3, %c0_4, %c0_5] : memref<1x8x512xf32, #tpu.memory_space<vmem>>, vector<1x8x512xf32>
    %6 = vector.shape_cast %5 : vector<1x8x512xf32> to vector<8x512xf32>
    %7 = math.absf %4 : vector<8x512xf32>
    %cst = arith.constant 0.000000e+00 : f32
    %8 = vector.broadcast %cst : f32 to vector<8x512xf32>
    %9 = arith.subf %8, %7 : vector<8x512xf32>
    %10 = math.exp %9 : vector<8x512xf32>
    %cst_6 = arith.constant 1.000000e+00 : f32
    %11 = vector.broadcast %cst_6 : f32 to vector<8x512xf32>
    %12 = arith.addf %11, %10 : vector<8x512xf32>
    %13 = tpu.reciprocal %12 {approx = true} : vector<8x512xf32> -> vector<8x512xf32>
    %cst_7 = arith.constant 0.000000e+00 : f32
    %14 = vector.broadcast %cst_7 : f32 to vector<8x512xf32>
    %15 = arith.cmpf oge, %4, %14 : vector<8x512xf32>
    %cst_8 = arith.constant 1.000000e+00 : f32
    %16 = vector.broadcast %cst_8 : f32 to vector<8x512xf32>
    %17 = arith.select %15, %16, %10 : vector<8x512xi1>, vector<8x512xf32>
    %18 = arith.mulf %17, %13 : vector<8x512xf32>
    %cst_9 = arith.constant 9.99999974E-5 : f32
    %cst_10 = arith.constant 0.999899983 : f32
    %19 = vector.broadcast %cst_9 : f32 to vector<8x512xf32>
    %20 = arith.maximumf %19, %18 : vector<8x512xf32>
    %21 = vector.broadcast %cst_10 : f32 to vector<8x512xf32>
    %22 = arith.minimumf %21, %20 : vector<8x512xf32>
    %cst_11 = arith.constant 0.000000e+00 : f32
    %23 = vector.broadcast %cst_11 : f32 to vector<8x512xf32>
    %24 = arith.maximumf %4, %23 : vector<8x512xf32>
    %25 = math.log %12 : vector<8x512xf32>
    %26 = arith.addf %24, %25 : vector<8x512xf32>
    %cst_12 = arith.constant 0.000000e+00 : f32
    %27 = vector.broadcast %cst_12 : f32 to vector<8x512xf32>
    %28 = arith.subf %27, %26 : vector<8x512xf32>
    %cst_13 = arith.constant -9.21034049 : f32
    %29 = vector.broadcast %cst_13 : f32 to vector<8x512xf32>
    %30 = arith.maximumf %28, %29 : vector<8x512xf32>
    %31 = arith.subf %4, %26 : vector<8x512xf32>
    %cst_14 = arith.constant -9.21034049 : f32
    %32 = vector.broadcast %cst_14 : f32 to vector<8x512xf32>
    %33 = arith.maximumf %31, %32 : vector<8x512xf32>
    %cst_15 = arith.constant 1.000000e+00 : f32
    %34 = vector.broadcast %cst_15 : f32 to vector<8x512xf32>
    %35 = arith.subf %34, %22 : vector<8x512xf32>
    %36 = arith.mulf %35, %35 : vector<8x512xf32>
    %37 = arith.mulf %33, %36 : vector<8x512xf32>
    %cst_16 = arith.constant 1.000000e+00 : f32
    %38 = vector.broadcast %cst_16 : f32 to vector<8x512xf32>
    %39 = arith.subf %38, %6 : vector<8x512xf32>
    %40 = arith.mulf %39, %39 : vector<8x512xf32>
    %41 = arith.mulf %40, %40 : vector<8x512xf32>
    %cst_17 = arith.constant 6.250000e-02 : f32
    %42 = vector.broadcast %cst_17 : f32 to vector<8x512xf32>
    %43 = arith.mulf %41, %42 : vector<8x512xf32>
    %44 = arith.mulf %22, %22 : vector<8x512xf32>
    %45 = arith.mulf %30, %44 : vector<8x512xf32>
    %46 = arith.mulf %45, %43 : vector<8x512xf32>
    %cst_18 = arith.constant 1.000000e+00 : f32
    %47 = vector.broadcast %cst_18 : f32 to vector<8x512xf32>
    %48 = arith.cmpf oeq, %6, %47 : vector<8x512xf32>
    %cst_19 = arith.constant 1.000000e+00 : f32
    %49 = vector.broadcast %cst_19 : f32 to vector<8x512xf32>
    %50 = arith.cmpf olt, %6, %49 : vector<8x512xf32>
    %cst_20 = arith.constant 0.000000e+00 : f32
    %51 = vector.broadcast %cst_20 : f32 to vector<8x512xf32>
    %52 = arith.select %50, %46, %51 : vector<8x512xi1>, vector<8x512xf32>
    %53 = arith.select %48, %37, %52 : vector<8x512xi1>, vector<8x512xf32>
    %cst_21 = arith.constant 1.000000e+00 : f32
    %54 = vector.broadcast %cst_21 : f32 to vector<8x512xf32>
    %55 = arith.cmpf oeq, %6, %54 : vector<8x512xf32>
    %cst_22 = arith.constant 1.000000e+00 : f32
    %cst_23 = arith.constant 0.000000e+00 : f32
    %56 = vector.broadcast %cst_22 : f32 to vector<8x512xf32>
    %57 = vector.broadcast %cst_23 : f32 to vector<8x512xf32>
    %58 = arith.select %55, %56, %57 : vector<8x512xi1>, vector<8x512xf32>
    %cst_24 = arith.constant 0.000000e+00 : f32
    %59 = vector.broadcast %cst_24 : f32 to vector<8x512xf32>
    %60 = arith.cmpf oeq, %6, %59 : vector<8x512xf32>
    %cst_25 = arith.constant -2.19722462 : f32
    %61 = vector.broadcast %cst_25 : f32 to vector<8x512xf32>
    %62 = arith.cmpf ogt, %4, %61 : vector<8x512xf32>
    %63 = arith.andi %60, %62 : vector<8x512xi1>
    %c0_26 = arith.constant 0 : index
    %c0_27 = arith.constant 0 : index
    %64 = vector.load %arg13[%c0_26, %c0_27] : memref<8x512xf32, #tpu.memory_space<vmem>>, vector<8x512xf32>
    %65 = arith.addf %64, %53 : vector<8x512xf32>
    %c0_28 = arith.constant 0 : index
    %c0_29 = arith.constant 0 : index
    %66 = vector.load %arg13[%c0_28, %c0_29] : memref<8x512xf32, #tpu.memory_space<vmem>>, vector<8x512xf32>
    tpu.vector_store %arg13[%c0_28, %c0_29], %65 {strides = array<i32>} : memref<8x512xf32, #tpu.memory_space<vmem>>, vector<8x512xf32>,
    %c0_30 = arith.constant 0 : index
    %c0_31 = arith.constant 0 : index
    %67 = vector.load %arg14[%c0_30, %c0_31] : memref<8x512xf32, #tpu.memory_space<vmem>>, vector<8x512xf32>
    %68 = arith.addf %67, %58 : vector<8x512xf32>
    %c0_32 = arith.constant 0 : index
    %c0_33 = arith.constant 0 : index
    %69 = vector.load %arg14[%c0_32, %c0_33] : memref<8x512xf32, #tpu.memory_space<vmem>>, vector<8x512xf32>
    tpu.vector_store %arg14[%c0_32, %c0_33], %68 {strides = array<i32>} : memref<8x512xf32, #tpu.memory_space<vmem>>, vector<8x512xf32>,
    %cst_34 = arith.constant 0.000000e+00 : f32
    %70 = vector.broadcast %cst_34 : f32 to vector<8x512xf32>
    %71 = arith.select %63, %45, %70 : vector<8x512xi1>, vector<8x512xf32>
    %c0_35 = arith.constant 0 : index
    %c0_36 = arith.constant 0 : index
    %72 = vector.load %arg17[%c0_35, %c0_36] : memref<8x512xf32, #tpu.memory_space<vmem>>, vector<8x512xf32>
    %73 = arith.addf %72, %71 : vector<8x512xf32>
    %c0_37 = arith.constant 0 : index
    %c0_38 = arith.constant 0 : index
    %74 = vector.load %arg17[%c0_37, %c0_38] : memref<8x512xf32, #tpu.memory_space<vmem>>, vector<8x512xf32>
    tpu.vector_store %arg17[%c0_37, %c0_38], %73 {strides = array<i32>} : memref<8x512xf32, #tpu.memory_space<vmem>>, vector<8x512xf32>,
    %cst_39 = arith.constant 1.000000e+00 : f32
    %cst_40 = arith.constant 0.000000e+00 : f32
    %75 = vector.broadcast %cst_39 : f32 to vector<8x512xf32>
    %76 = vector.broadcast %cst_40 : f32 to vector<8x512xf32>
    %77 = arith.select %63, %75, %76 : vector<8x512xi1>, vector<8x512xf32>
    %c0_41 = arith.constant 0 : index
    %c0_42 = arith.constant 0 : index
    %78 = vector.load %arg18[%c0_41, %c0_42] : memref<8x512xf32, #tpu.memory_space<vmem>>, vector<8x512xf32>
    %79 = arith.addf %78, %77 : vector<8x512xf32>
    %c0_43 = arith.constant 0 : index
    %c0_44 = arith.constant 0 : index
    %80 = vector.load %arg18[%c0_43, %c0_44] : memref<8x512xf32, #tpu.memory_space<vmem>>, vector<8x512xf32>
    tpu.vector_store %arg18[%c0_43, %c0_44], %79 {strides = array<i32>} : memref<8x512xf32, #tpu.memory_space<vmem>>, vector<8x512xf32>,
    %c0_45 = arith.constant 0 : index
    %c0_46 = arith.constant 0 : index
    %c0_47 = arith.constant 0 : index
    %81 = vector.load %arg5[%c0_45, %c0_46, %c0_47] : memref<1x2x512xf32, #tpu.memory_space<vmem>>, vector<1x2x512xf32>
    %82 = vector.shape_cast %81 : vector<1x2x512xf32> to vector<2x512xf32>
    %c0_48 = arith.constant 0 : index
    %c0_49 = arith.constant 0 : index
    %c0_50 = arith.constant 0 : index
    %83 = vector.load %arg6[%c0_48, %c0_49, %c0_50] : memref<1x2x512xf32, #tpu.memory_space<vmem>>, vector<1x2x512xf32>
    %84 = vector.shape_cast %83 : vector<1x2x512xf32> to vector<2x512xf32>
    %85 = math.absf %82 : vector<2x512xf32>
    %cst_51 = arith.constant 0.000000e+00 : f32
    %86 = vector.broadcast %cst_51 : f32 to vector<2x512xf32>
    %87 = arith.subf %86, %85 : vector<2x512xf32>
    %88 = math.exp %87 : vector<2x512xf32>
    %cst_52 = arith.constant 1.000000e+00 : f32
    %89 = vector.broadcast %cst_52 : f32 to vector<2x512xf32>
    %90 = arith.addf %89, %88 : vector<2x512xf32>
    %91 = tpu.reciprocal %90 {approx = true} : vector<2x512xf32> -> vector<2x512xf32>
    %cst_53 = arith.constant 0.000000e+00 : f32
    %92 = vector.broadcast %cst_53 : f32 to vector<2x512xf32>
    %93 = arith.cmpf oge, %82, %92 : vector<2x512xf32>
    %cst_54 = arith.constant 1.000000e+00 : f32
    %94 = vector.broadcast %cst_54 : f32 to vector<2x512xf32>
    %95 = arith.select %93, %94, %88 : vector<2x512xi1>, vector<2x512xf32>
    %96 = arith.mulf %95, %91 : vector<2x512xf32>
    %cst_55 = arith.constant 9.99999974E-5 : f32
    %cst_56 = arith.constant 0.999899983 : f32
    %97 = vector.broadcast %cst_55 : f32 to vector<2x512xf32>
    %98 = arith.maximumf %97, %96 : vector<2x512xf32>
    %99 = vector.broadcast %cst_56 : f32 to vector<2x512xf32>
    %100 = arith.minimumf %99, %98 : vector<2x512xf32>
    %cst_57 = arith.constant 0.000000e+00 : f32
    %101 = vector.broadcast %cst_57 : f32 to vector<2x512xf32>
    %102 = arith.maximumf %82, %101 : vector<2x512xf32>
    %103 = math.log %90 : vector<2x512xf32>
    %104 = arith.addf %102, %103 : vector<2x512xf32>
    %cst_58 = arith.constant 0.000000e+00 : f32
    %105 = vector.broadcast %cst_58 : f32 to vector<2x512xf32>
    %106 = arith.subf %105, %104 : vector<2x512xf32>
    %cst_59 = arith.constant -9.21034049 : f32
    %107 = vector.broadcast %cst_59 : f32 to vector<2x512xf32>
    %108 = arith.maximumf %106, %107 : vector<2x512xf32>
    %109 = arith.subf %82, %104 : vector<2x512xf32>
    %cst_60 = arith.constant -9.21034049 : f32
    %110 = vector.broadcast %cst_60 : f32 to vector<2x512xf32>
    %111 = arith.maximumf %109, %110 : vector<2x512xf32>
    %cst_61 = arith.constant 1.000000e+00 : f32
    %112 = vector.broadcast %cst_61 : f32 to vector<2x512xf32>
    %113 = arith.subf %112, %100 : vector<2x512xf32>
    %114 = arith.mulf %113, %113 : vector<2x512xf32>
    %115 = arith.mulf %111, %114 : vector<2x512xf32>
    %cst_62 = arith.constant 1.000000e+00 : f32
    %116 = vector.broadcast %cst_62 : f32 to vector<2x512xf32>
    %117 = arith.subf %116, %84 : vector<2x512xf32>
    %118 = arith.mulf %117, %117 : vector<2x512xf32>
    %119 = arith.mulf %118, %118 : vector<2x512xf32>
    %120 = arith.mulf %100, %100 : vector<2x512xf32>
    %121 = arith.mulf %108, %120 : vector<2x512xf32>
    %122 = arith.mulf %121, %119 : vector<2x512xf32>
    %cst_63 = arith.constant 1.000000e+00 : f32
    %123 = vector.broadcast %cst_63 : f32 to vector<2x512xf32>
    %124 = arith.cmpf oeq, %84, %123 : vector<2x512xf32>
    %cst_64 = arith.constant 1.000000e+00 : f32
    %125 = vector.broadcast %cst_64 : f32 to vector<2x512xf32>
    %126 = arith.cmpf olt, %84, %125 : vector<2x512xf32>
    %cst_65 = arith.constant 0.000000e+00 : f32
    %127 = vector.broadcast %cst_65 : f32 to vector<2x512xf32>
    %128 = arith.select %126, %122, %127 : vector<2x512xi1>, vector<2x512xf32>
    %129 = arith.select %124, %115, %128 : vector<2x512xi1>, vector<2x512xf32>
    %cst_66 = arith.constant 1.000000e+00 : f32
    %130 = vector.broadcast %cst_66 : f32 to vector<2x512xf32>
    %131 = arith.cmpf oeq, %84, %130 : vector<2x512xf32>
    %cst_67 = arith.constant 1.000000e+00 : f32
    %cst_68 = arith.constant 0.000000e+00 : f32
    %132 = vector.broadcast %cst_67 : f32 to vector<2x512xf32>
    %133 = vector.broadcast %cst_68 : f32 to vector<2x512xf32>
    %134 = arith.select %131, %132, %133 : vector<2x512xi1>, vector<2x512xf32>
    %c0_69 = arith.constant 0 : index
    %c0_70 = arith.constant 0 : index
    %135 = vector.load %arg15[%c0_69, %c0_70] : memref<8x512xf32, #tpu.memory_space<vmem>>, vector<2x512xf32>
    %136 = arith.addf %135, %129 : vector<2x512xf32>
    %c0_71 = arith.constant 0 : index
    %c0_72 = arith.constant 0 : index
    %137 = vector.load %arg15[%c0_71, %c0_72] : memref<8x512xf32, #tpu.memory_space<vmem>>, vector<2x512xf32>
    tpu.vector_store %arg15[%c0_71, %c0_72], %136 {strides = array<i32>} : memref<8x512xf32, #tpu.memory_space<vmem>>, vector<2x512xf32>,
    %c0_73 = arith.constant 0 : index
    %c0_74 = arith.constant 0 : index
    %138 = vector.load %arg16[%c0_73, %c0_74] : memref<8x512xf32, #tpu.memory_space<vmem>>, vector<2x512xf32>
    %139 = arith.addf %138, %134 : vector<2x512xf32>
    %c0_75 = arith.constant 0 : index
    %c0_76 = arith.constant 0 : index
    %140 = vector.load %arg16[%c0_75, %c0_76] : memref<8x512xf32, #tpu.memory_space<vmem>>, vector<2x512xf32>
    tpu.vector_store %arg16[%c0_75, %c0_76], %139 {strides = array<i32>} : memref<8x512xf32, #tpu.memory_space<vmem>>, vector<2x512xf32>,
    %c0_i32_77 = arith.constant 0 : i32
    %141 = arith.cmpi eq, %arg2, %c0_i32_77 : i32
    %142 = arith.extui %141 : i1 to i32
    %c0_i32_78 = arith.constant 0 : i32
    %143 = arith.cmpi ne, %142, %c0_i32_78 : i32
    scf.if %143 {
      %c0_79 = arith.constant 0 : index
      %c0_80 = arith.constant 0 : index
      %144 = vector.load %arg13[%c0_79, %c0_80] : memref<8x512xf32, #tpu.memory_space<vmem>>, vector<8x512xf32>
      %145 = vector.shape_cast %144 : vector<8x512xf32> to vector<1x8x512xf32>
      %cst_81 = arith.constant dense<0.000000e+00> : vector<1xf32>
      %146 = vector.multi_reduction <add>, %145, %cst_81 [1, 2] : vector<1x8x512xf32> to vector<1xf32>
      %147 = vector.shape_cast %146 : vector<1xf32> to vector<1x1x1xf32>
      %148 = vector.extract %147[0, 0, 0] : f32 from vector<1x1x1xf32>
      %149 = vector.broadcast %148 : f32 to vector<1x1x1xf32>
      %c0_82 = arith.constant 0 : index
      %c0_83 = arith.constant 0 : index
      %c0_84 = arith.constant 0 : index
      %150 = vector.load %arg7[%c0_82, %c0_83, %c0_84] : memref<1x1x1xf32, #tpu.memory_space<vmem>>, vector<1x1x1xf32>
      tpu.vector_store %arg7[%c0_82, %c0_83, %c0_84], %149 {strides = array<i32>} : memref<1x1x1xf32, #tpu.memory_space<vmem>>, vector<1x1x1xf32>,
      %c0_85 = arith.constant 0 : index
      %c0_86 = arith.constant 0 : index
      %151 = vector.load %arg14[%c0_85, %c0_86] : memref<8x512xf32, #tpu.memory_space<vmem>>, vector<8x512xf32>
      %152 = vector.shape_cast %151 : vector<8x512xf32> to vector<1x8x512xf32>
      %cst_87 = arith.constant dense<0.000000e+00> : vector<1xf32>
      %153 = vector.multi_reduction <add>, %152, %cst_87 [1, 2] : vector<1x8x512xf32> to vector<1xf32>
      %154 = vector.shape_cast %153 : vector<1xf32> to vector<1x1x1xf32>
      %155 = vector.extract %154[0, 0, 0] : f32 from vector<1x1x1xf32>
      %156 = vector.broadcast %155 : f32 to vector<1x1x1xf32>
      %c0_88 = arith.constant 0 : index
      %c0_89 = arith.constant 0 : index
      %c0_90 = arith.constant 0 : index
      %157 = vector.load %arg8[%c0_88, %c0_89, %c0_90] : memref<1x1x1xf32, #tpu.memory_space<vmem>>, vector<1x1x1xf32>
      tpu.vector_store %arg8[%c0_88, %c0_89, %c0_90], %156 {strides = array<i32>} : memref<1x1x1xf32, #tpu.memory_space<vmem>>, vector<1x1x1xf32>,
      %c0_91 = arith.constant 0 : index
      %c0_92 = arith.constant 0 : index
      %158 = vector.load %arg15[%c0_91, %c0_92] : memref<8x512xf32, #tpu.memory_space<vmem>>, vector<8x512xf32>
      %159 = vector.shape_cast %158 : vector<8x512xf32> to vector<1x8x512xf32>
      %cst_93 = arith.constant dense<0.000000e+00> : vector<1xf32>
      %160 = vector.multi_reduction <add>, %159, %cst_93 [1, 2] : vector<1x8x512xf32> to vector<1xf32>
      %161 = vector.shape_cast %160 : vector<1xf32> to vector<1x1x1xf32>
      %162 = vector.extract %161[0, 0, 0] : f32 from vector<1x1x1xf32>
      %163 = vector.broadcast %162 : f32 to vector<1x1x1xf32>
      %c0_94 = arith.constant 0 : index
      %c0_95 = arith.constant 0 : index
      %c0_96 = arith.constant 0 : index
      %164 = vector.load %arg9[%c0_94, %c0_95, %c0_96] : memref<1x1x1xf32, #tpu.memory_space<vmem>>, vector<1x1x1xf32>
      tpu.vector_store %arg9[%c0_94, %c0_95, %c0_96], %163 {strides = array<i32>} : memref<1x1x1xf32, #tpu.memory_space<vmem>>, vector<1x1x1xf32>,
      %c0_97 = arith.constant 0 : index
      %c0_98 = arith.constant 0 : index
      %165 = vector.load %arg16[%c0_97, %c0_98] : memref<8x512xf32, #tpu.memory_space<vmem>>, vector<8x512xf32>
      %166 = vector.shape_cast %165 : vector<8x512xf32> to vector<1x8x512xf32>
      %cst_99 = arith.constant dense<0.000000e+00> : vector<1xf32>
      %167 = vector.multi_reduction <add>, %166, %cst_99 [1, 2] : vector<1x8x512xf32> to vector<1xf32>
      %168 = vector.shape_cast %167 : vector<1xf32> to vector<1x1x1xf32>
      %169 = vector.extract %168[0, 0, 0] : f32 from vector<1x1x1xf32>
      %170 = vector.broadcast %169 : f32 to vector<1x1x1xf32>
      %c0_100 = arith.constant 0 : index
      %c0_101 = arith.constant 0 : index
      %c0_102 = arith.constant 0 : index
      %171 = vector.load %arg10[%c0_100, %c0_101, %c0_102] : memref<1x1x1xf32, #tpu.memory_space<vmem>>, vector<1x1x1xf32>
      tpu.vector_store %arg10[%c0_100, %c0_101, %c0_102], %170 {strides = array<i32>} : memref<1x1x1xf32, #tpu.memory_space<vmem>>, vector<1x1x1xf32>,
      %c0_103 = arith.constant 0 : index
      %c0_104 = arith.constant 0 : index
      %172 = vector.load %arg17[%c0_103, %c0_104] : memref<8x512xf32, #tpu.memory_space<vmem>>, vector<8x512xf32>
      %173 = vector.shape_cast %172 : vector<8x512xf32> to vector<1x8x512xf32>
      %cst_105 = arith.constant dense<0.000000e+00> : vector<1xf32>
      %174 = vector.multi_reduction <add>, %173, %cst_105 [1, 2] : vector<1x8x512xf32> to vector<1xf32>
      %175 = vector.shape_cast %174 : vector<1xf32> to vector<1x1x1xf32>
      %176 = vector.extract %175[0, 0, 0] : f32 from vector<1x1x1xf32>
      %177 = vector.broadcast %176 : f32 to vector<1x1x1xf32>
      %c0_106 = arith.constant 0 : index
      %c0_107 = arith.constant 0 : index
      %c0_108 = arith.constant 0 : index
      %178 = vector.load %arg11[%c0_106, %c0_107, %c0_108] : memref<1x1x1xf32, #tpu.memory_space<vmem>>, vector<1x1x1xf32>
      tpu.vector_store %arg11[%c0_106, %c0_107, %c0_108], %177 {strides = array<i32>} : memref<1x1x1xf32, #tpu.memory_space<vmem>>, vector<1x1x1xf32>,
      %c0_109 = arith.constant 0 : index
      %c0_110 = arith.constant 0 : index
      %179 = vector.load %arg18[%c0_109, %c0_110] : memref<8x512xf32, #tpu.memory_space<vmem>>, vector<8x512xf32>
      %180 = vector.shape_cast %179 : vector<8x512xf32> to vector<1x8x512xf32>
      %cst_111 = arith.constant dense<0.000000e+00> : vector<1xf32>
      %181 = vector.multi_reduction <add>, %180, %cst_111 [1, 2] : vector<1x8x512xf32> to vector<1xf32>
      %182 = vector.shape_cast %181 : vector<1xf32> to vector<1x1x1xf32>
      %183 = vector.extract %182[0, 0, 0] : f32 from vector<1x1x1xf32>
      %184 = vector.broadcast %183 : f32 to vector<1x1x1xf32>
      %c0_112 = arith.constant 0 : index
      %c0_113 = arith.constant 0 : index
      %c0_114 = arith.constant 0 : index
      %185 = vector.load %arg12[%c0_112, %c0_113, %c0_114] : memref<1x1x1xf32, #tpu.memory_space<vmem>>, vector<1x1x1xf32>
      tpu.vector_store %arg12[%c0_112, %c0_113, %c0_114], %184 {strides = array<i32>} : memref<1x1x1xf32, #tpu.memory_space<vmem>>, vector<1x1x1xf32>,
    } else {
    }
    return
  }
  func.func @transform_0(%arg0: i32, %arg1: i32, %arg2: i32) -> (i32, i32, i32) {
    %c1_i32 = arith.constant 1 : i32
    %0 = arith.muli %arg1, %c1_i32 : i32
    %1 = arith.addi %0, %arg2 : i32
    %c0_i32 = arith.constant 0 : i32
    %c0_i32_0 = arith.constant 0 : i32
    return %arg0, %1, %c0_i32 : i32, i32, i32
  }
  func.func @transform_1(%arg0: i32, %arg1: i32, %arg2: i32) -> (i32, i32, i32) {
    %c1_i32 = arith.constant 1 : i32
    %0 = arith.muli %arg1, %c1_i32 : i32
    %1 = arith.addi %0, %arg2 : i32
    %c0_i32 = arith.constant 0 : i32
    %c0_i32_0 = arith.constant 0 : i32
    return %arg0, %1, %c0_i32 : i32, i32, i32
  }
  func.func @transform_2(%arg0: i32, %arg1: i32, %arg2: i32) -> (i32, i32, i32) {
    %c1_i32 = arith.constant 1 : i32
    %0 = arith.muli %arg1, %c1_i32 : i32
    %1 = arith.addi %0, %arg2 : i32
    %c0_i32 = arith.constant 0 : i32
    %c0_i32_0 = arith.constant 0 : i32
    return %arg0, %1, %c0_i32 : i32, i32, i32
  }
  func.func @transform_3(%arg0: i32, %arg1: i32, %arg2: i32) -> (i32, i32, i32) {
    %c1_i32 = arith.constant 1 : i32
    %0 = arith.muli %arg1, %c1_i32 : i32
    %1 = arith.addi %0, %arg2 : i32
    %c0_i32 = arith.constant 0 : i32
    %c0_i32_0 = arith.constant 0 : i32
    return %arg0, %1, %c0_i32 : i32, i32, i32
  }
  func.func @transform_4(%arg0: i32, %arg1: i32, %arg2: i32) -> (i32, i32, i32) {
    %c0_i32 = arith.constant 0 : i32
    %c0_i32_0 = arith.constant 0 : i32
    return %arg0, %arg1, %c0_i32 : i32, i32, i32
  }
  func.func @transform_5(%arg0: i32, %arg1: i32, %arg2: i32) -> (i32, i32, i32) {
    %c0_i32 = arith.constant 0 : i32
    %c0_i32_0 = arith.constant 0 : i32
    return %arg0, %arg1, %c0_i32 : i32, i32, i32
  }
  func.func @transform_6(%arg0: i32, %arg1: i32, %arg2: i32) -> (i32, i32, i32) {
    %c0_i32 = arith.constant 0 : i32
    %c0_i32_0 = arith.constant 0 : i32
    return %arg0, %arg1, %c0_i32 : i32, i32, i32
  }
  func.func @transform_7(%arg0: i32, %arg1: i32, %arg2: i32) -> (i32, i32, i32) {
    %c0_i32 = arith.constant 0 : i32
    %c0_i32_0 = arith.constant 0 : i32
    return %arg0, %arg1, %c0_i32 : i32, i32, i32
  }
  func.func @transform_8(%arg0: i32, %arg1: i32, %arg2: i32) -> (i32, i32, i32) {
    %c0_i32 = arith.constant 0 : i32
    %c0_i32_0 = arith.constant 0 : i32
    return %arg0, %arg1, %c0_i32 : i32, i32, i32
  }
  func.func @transform_9(%arg0: i32, %arg1: i32, %arg2: i32) -> (i32, i32, i32) {
    %c0_i32 = arith.constant 0 : i32
    %c0_i32_0 = arith.constant 0 : i32
    return %arg0, %arg1, %c0_i32 : i32, i32, i32
  }
}

</mosaic_0001>

<bundles_post_ra>
// kernel: h_loc_loss.1
= control target key start
LH: loop header
LB: loop body
LE: loop exit
PB: predicated region body
PF: predicated region fallthrough
CT: control target
= control target key end

     0   :  { %s1514_s30 = smov 0   ;;  %s1516_s10 = smov 0   ;;  %s1781_s0 = inlined_call_operand.vmem [shape: f32[2,8,512], index: 0, kind: input, shape index: {}]   ;;  %s1782_s1 = inlined_call_operand.vmem [shape: f32[2,8,512], index: 1, kind: input, shape index: {}]   ;;  %s1783_s2 = inlined_call_operand.vmem [shape: f32[2,2,512], index: 2, kind: input, shape index: {}]   ;;  %s1784_s3 = inlined_call_operand.vmem [shape: f32[2,2,512], index: 3, kind: input, shape index: {}]   ;;  %s1785_s4 = inlined_call_operand.vmem [shape: f32[2,1,1], index: 4, kind: output, shape index: {0}]   ;;  %s1786_s5 = inlined_call_operand.vmem [shape: f32[2,1,1], index: 5, kind: output, shape index: {1}]   ;;  %s1787_s6 = inlined_call_operand.vmem [shape: f32[2,1,1], index: 6, kind: output, shape index: {2}]   ;;  %s1788_s7 = inlined_call_operand.vmem [shape: f32[2,1,1], index: 7, kind: output, shape index: {3}]   ;;  %s1789_s8 = inlined_call_operand.vmem [shape: f32[2,1,1], index: 8, kind: output, shape index: {4}]   ;;  %s1790_s9 = inlined_call_operand.vmem [shape: f32[2,1,1], index: 9, kind: output, shape index: {5}]  }
   0x1   :  { %s1518_s11 = smov 0  }
   0x2 LB: > { %s39_s12 = sadd.s32 1, %s1456_s10  ;;  %p1355_p0 = scmp.ge.s32.totalorder %s1460_s11, 1  ;;  %s1460_s11 = sphi %s1518_s11, %s20_s11   ;;  %s1456_s10 = sphi %s1516_s10, %s1805_s10   ;;  %s1452_s30 = sphi %s1514_s30, %s1804_s30  }
   0x3   : > { %p41_p1 = scmp.ge.s32.totalorder %s39_s12, 2  ;;  %p399_p2 = scmp.lt.s32.totalorder %s1460_s11, 3 }
   0x5   : > { %s1807_s12 = smov (%p41_p1, %s39_s12), 0  ;;  %p400_p3 = pnand %p1355_p0, %p399_p2 }
   0x6   : > { %p502_p4 = scmp.lt.s32.totalorder (!%p400_p3), %s1452_s30, 1 }
   0x7   : > { %403 = sbr.rel (%p400_p3) target bundleno = 315 (0x13b), region = 36 }
   0xc   : > { %v1462_v0 = vmov 0.0   ;;  %v1463_v1 = vmov 1983009808   ;;  %v865_v3 = vlaneseq  ;;  %s1809_s30 = smov (!%p502_p4, %s1452_s30), 1 }
   0xd   : > { %593 = vst [vmem:[#allocation4 + $0x10] sm:$0xff] %v1462_v0  ;;  %594 = vst [vmem:[#allocation4] sm:$0xff] %v1462_v0  ;;  %v863_v2 = vunpack.c.l.s4 %v1463_v1  ;;  %s1366_s13 = sshll.u32 %s1809_s30, 5  ;;  %s1368_s14 = sshll.u32 %s1809_s30, 3 }
   0xe   : > { %595 = vst [vmem:[#allocation4 + $0x18] sm:$0xff] %v1462_v0  ;;  %596 = vst [vmem:[#allocation4 + $0x8] sm:$0xff] %v1462_v0  ;;  %s521_s17 = scalar_lea.vmem %s1782_s1, %s1366_s13  ;;  %s1550_s20 = scalar_lea.vmem %s1781_s0, %s1366_s13  ;;  %v866_v5 = vshrl.u32 %v865_v3, 7 }
   0xf   : > { %597 = vst [vmem:[#allocation5] sm:$0xff] %v1462_v0  ;;  %598 = vst [vmem:[#allocation5 + $0x18] sm:$0xff] %v1462_v0  ;;  %v864_v4 = vunpack.c.0.s8 %v863_v2  ;;  %v1552_v6 = vld [vmem:[%s521_s17] sm:$0xff]  ;;  %v1554_v7 = vld [vmem:[%s521_s17 + $0x8] sm:$0xff]  ;;  %s543_s23 = scalar_lea.vmem %s1784_s3, %s1368_s14  ;;  %s532_s26 = scalar_lea.vmem %s1783_s2, %s1368_s14 }
  0x10   : > { %599 = vst [vmem:[#allocation5 + $0x8] sm:$0xff] %v1462_v0  ;;  %600 = vst [vmem:[#allocation5 + $0x10] sm:$0xff] %v1462_v0  ;;  %v1559_v8 = vld [vmem:[%s521_s17 + $0x10] sm:$0xff]  ;;  %v1561_v9 = vld [vmem:[%s521_s17 + $0x18] sm:$0xff]  ;;  %vm733_vm0 = vcmp.eq.f32.partialorder %v1552_v6, 1.0  ;;  %vm734_vm1 = vcmp.eq.f32.partialorder %v1554_v7, 1.0  ;;  %s550_s29 = scalar_lea.vmem %s1785_s4, %s1809_s30  ;;  %s556_s16 = scalar_lea.vmem %s1786_s5, %s1809_s30 }
  0x11   : > { %v1566_v10 = vld [vmem:[%s1550_s20] sm:$0xff]  ;;  %vm735_vm2 = vcmp.eq.f32.partialorder %v1559_v8, 1.0  ;;  %vm1792_vm3 = vcmp.eq.f32.partialorder %v1561_v9, 1.0  ;;  %v749_v11 = vsel %vm733_vm0, 1.0, %v1462_v0  ;;  %v1574_v12 = vld [vmem:[%s1550_s20 + $0x8] sm:$0xff]  ;;  %v1577_v13 = vld [vmem:[%s1550_s20 + $0x10] sm:$0xff]  ;;  %v1588_v18 = vsub.s32 %v864_v4, %v866_v5  ;;  %s568_s24 = scalar_lea.vmem %s1788_s7, %s1809_s30  ;;  %s574_s28 = scalar_lea.vmem %s1789_s8, %s1809_s30 }
  0x12   : > { %v750_v14 = vsel %vm734_vm1, 1.0, %v1462_v0  ;;  %v751_v15 = vsel %vm735_vm2, 1.0, %v1462_v0  ;;  %v617_v16 = vand.u32 2147483647, %v1566_v10  ;;  %v1586_v17 = vld [vmem:[%s543_s23] sm:$0xff]  ;;  %v752_v22 = vsel %vm1792_vm3, 1.0, %v1462_v0  ;;  %s580_s15 = scalar_lea.vmem %s1790_s9, %s1809_s30 }
  0x13   : > { %v950_v19 = vadd.f32 %v750_v14, %v749_v11  ;;  %v618_v20 = vand.u32 2147483647, %v1574_v12  ;;  %v619_v21 = vand.u32 2147483647, %v1577_v13  ;;  %vm1791_vm4 = vcmp.eq.f32.partialorder %v1586_v17, 1.0  ;;  %v1603_v33 = vld [vmem:[%s532_s26] sm:$0xff] }
  0x14   : > { %v621_v23 = vsub.f32 0.0, %v617_v16  ;;  %v855_v27 = vsel %vm1791_vm4, 1.0, %v1462_v0  ;;  %v1607_v41 = vld [vmem:[%s1550_s20 + $0x18] sm:$0xff]  ;;  %v823_v43 = vand.u32 2147483647, %v1603_v33  ;;  %v706_v3 = vsub.f32 1.0, %v1554_v7  ;;  %s562_s20 = scalar_lea.vmem %s1787_s6, %s1809_s30 }
  0x15   : > { %v951_v24 = vadd.f32 %v950_v19, %v751_v15  ;;  %v622_v25 = vsub.f32 0.0, %v618_v20  ;;  %v623_v26 = vsub.f32 0.0, %v619_v21  ;;  %v895_v31 = vcombine.high %v855_v27, %v855_v27 }
  0x16   : > { %v890_v28 = vld [vmem:[#allocation5] sm:$0x3]  ;;  %v625_v29 = vmul.f32 1.442695, %v621_v23  ;;  %v891_v30 = vld [vmem:[#allocation5 + $0x18] sm:$0x3]  ;;  %v902_v32 = vrot.slane %v855_v27, %v1588_v18  ;;  %v710_v19 = vmul.f32 %v706_v3, %v706_v3 }
  0x17   : > { %v952_v34 = vadd.f32 %v951_v24, %v752_v22  ;;  %v627_v35 = vmul.f32 1.442695, %v622_v25  ;;  %v629_v36 = vmul.f32 1.442695, %v623_v26  ;;  %v892_v37 = vld [vmem:[#allocation5 + $0x8] sm:$0x3]  ;;  %v909_v38 = vrot.slane %v895_v31, %v1588_v18 }
  0x18   : > { %1408 = vpow2.f32 %v625_v29  ;;  %v910_v39 = vcombine.high %v902_v32, %v902_v32  ;;  %v916_v40 = vadd.f32 %v902_v32, %v890_v28  ;;  %v893_v42 = vld [vmem:[#allocation5 + $0x10] sm:$0x3]  ;;  %v620_v47 = vand.u32 2147483647, %v1607_v41 }
  0x19   : > { %953 = vadd.xlane.f32.xlu0 %v952_v34  ;;  %1410 = vpow2.f32 %v627_v35  ;;  %v911_v44 = vcombine.high %v909_v38, %v909_v38  ;;  %v918_v46 = vadd.f32 %v909_v38, %v892_v37  ;;  %v824_v50 = vsub.f32 0.0, %v823_v43 }
  0x1a   : > { %1412 = vpow2.f32 %v629_v36  ;;  %v917_v45 = vadd.f32 %v910_v39, %v891_v30  ;;  %920 = vst [vmem:[#allocation5] sm:$0x3] %v916_v40  ;;  %v624_v49 = vsub.f32 0.0, %v620_v47  ;;  %v707_v4 = vsub.f32 1.0, %v1559_v8 }
  0x1b   : > { %v919_v48 = vadd.f32 %v911_v44, %v893_v42  ;;  %922 = vst [vmem:[#allocation5 + $0x8] sm:$0x3] %v918_v46  ;;  %v825_v53 = vmul.f32 1.442695, %v824_v50  ;;  %v705_v5 = vsub.f32 1.0, %v1552_v6  ;;  %v708_v11 = vsub.f32 1.0, %v1561_v9 }
  0x1c   : > { %921 = vst [vmem:[#allocation5 + $0x18] sm:$0x3] %v917_v45  ;;  %v631_v51 = vmul.f32 1.442695, %v624_v49  ;;  %v711_v20 = vmul.f32 %v707_v4, %v707_v4  ;;  %vm641_vm5 = vcmp.ge.f32.partialorder %v1566_v10, 0.0  ;;  %vm642_vm6 = vcmp.ge.f32.partialorder %v1574_v12, 0.0 }
  0x1d   : > { %923 = vst [vmem:[#allocation5 + $0x10] sm:$0x3] %v919_v48  ;;  %v709_v16 = vmul.f32 %v705_v5, %v705_v5  ;;  %v712_v21 = vmul.f32 %v708_v11, %v708_v11  ;;  %vm829_vm7 = vcmp.ge.f32.partialorder %v1603_v33, 0.0  ;;  %vm643_vm8 = vcmp.ge.f32.partialorder %v1577_v13, 0.0 }
  0x1e   : > { %1414 = vpow2.f32 %v631_v51  ;;  %v714_v25 = vmul.f32 %v710_v19, %v710_v19  ;;  %v715_v26 = vmul.f32 %v711_v20, %v711_v20  ;;  %v834_v27 = vmax.f32 %v1603_v33, 0.0 }
  0x1f   : > { %1416 = vpow2.f32 %v825_v53  ;;  %v713_v24 = vmul.f32 %v709_v16, %v709_v16  ;;  %v845_v28 = vsub.f32 1.0, %v1586_v17  ;;  %v716_v30 = vmul.f32 %v712_v21, %v712_v21 }
  0x20   : > { %vm644_vm9 = vcmp.ge.f32.partialorder %v1607_v41, 0.0  ;;  %v661_v34 = vmax.f32 %v1566_v10, 0.0  ;;  %v662_v35 = vmax.f32 %v1574_v12, 0.0  ;;  %v663_v38 = vmax.f32 %v1577_v13, 0.0 }
  0x21   : > { %v982_v52 = vld [vmem:[#allocation5] sm:$0xff]  ;;  %v664_v39 = vmax.f32 %v1607_v41, 0.0  ;;  %v1626_v44 = vmul.f32 0.0625, %v713_v24  ;;  %v1628_v45 = vmul.f32 0.0625, %v714_v25  ;;  %v1630_v46 = vmul.f32 0.0625, %v715_v26 }
  0x22   : > { %v984_v55 = vld [vmem:[#allocation5 + $0x8] sm:$0xff]  ;;  %v1632_v50 = vmul.f32 0.0625, %v716_v30  ;;  %vm753_vm10 = vcmp.eq.f32.partialorder %v1552_v6, 0.0  ;;  %vm757_vm11 = vcmp.gt.f32.partialorder %v1566_v10, -2.1972246  ;;  %vm754_vm12 = vcmp.eq.f32.partialorder %v1554_v7, 0.0 }
  0x23   : > { %v983_v54 = vld [vmem:[#allocation5 + $0x18] sm:$0xff]  ;;  %vm758_vm13 = vcmp.gt.f32.partialorder %v1574_v12, -2.1972246  ;;  %vm755_vm14 = vcmp.eq.f32.partialorder %v1559_v8, 0.0  ;;  %vm759_vm15 = vcmp.gt.f32.partialorder %v1577_v13, -2.1972246  ;;  %vm1661_vm3 = vmand %vm753_vm10, %vm757_vm11 }
  0x24   : > { %v986_v56 = vadd.f32 %v983_v54, %v982_v52  ;;  %v985_v58 = vld [vmem:[#allocation5 + $0x10] sm:$0xff]  ;;  %vm1670_vm4 = vmand %vm754_vm12, %vm758_vm13  ;;  %vm852_vm11 = vcmp.lt.f32.partialorder %v1586_v17, 1.0  ;;  %vm1803_vm12 = vcmp.eq.f32.partialorder %v1586_v17, 1.0  ;;  %v805_v17 = vsel %vm1661_vm3, 1.0, %v1462_v0 }
  0x25   : > { %v1409_v57 = vpop.eup %1408  ;;  %vm1679_vm10 = vmand %vm755_vm14, %vm759_vm15 }
  0x26   : > { %v1411_v59 = vpop.eup %1410  ;;  %v987_v60 = vadd.f32 %v986_v56, %v984_v55  ;;  %v633_v61 = vadd.f32 1.0, %v1409_v57  ;;  %v645_v23 = vsel %vm641_vm5, 1.0, %v1409_v57  ;;  %vm737_vm5 = vcmp.lt.f32.partialorder %v1552_v6, 1.0 }
  0x27   : > { %v1413_v62 = vpop.eup %1412  ;;  %v634_v63 = vadd.f32 1.0, %v1411_v59  ;;  %v646_v29 = vsel %vm642_vm6, 1.0, %v1411_v59  ;;  %vm738_vm6 = vcmp.lt.f32.partialorder %v1554_v7, 1.0  ;;  %v846_v7 = vmul.f32 %v845_v28, %v845_v28 }
  0x28   : > { %v988_v1 = vadd.f32 %v987_v60, %v985_v58  ;;  %v635_v2 = vadd.f32 1.0, %v1413_v62  ;;  %1418 = vrcp.f32 %v633_v61  ;;  %v647_v32 = vsel %vm643_vm8, 1.0, %v1413_v62 }
  0x29   : > { %1420 = vrcp.f32 %v634_v63  ;;  %vm756_vm8 = vcmp.eq.f32.partialorder %v1561_v9, 0.0 }
  0x2a   : > { %989 = vadd.xlane.f32.xlu1 %v988_v1  ;;  %1422 = vrcp.f32 %v635_v2 }
  0x2b   : > { %1424 = vlog2.f32 %v633_v61  ;;  %v1415_v14 = vpop.eup %1414 }
  0x2c   : > { %1426 = vlog2.f32 %v634_v63  ;;  %v636_v15 = vadd.f32 1.0, %v1415_v14  ;;  %v1417_v22 = vpop.eup %1416  ;;  %v648_v53 = vsel %vm644_vm9, 1.0, %v1415_v14  ;;  %vm760_vm9 = vcmp.gt.f32.partialorder %v1607_v41, -2.1972246 }
  0x2d   : > { %1428 = vlog2.f32 %v635_v2  ;;  %v827_v40 = vadd.f32 1.0, %v1417_v22  ;;  %v1638_v52 = vsel %vm829_vm7, 1.0, %v1417_v22  ;;  %vm739_vm7 = vcmp.lt.f32.partialorder %v1559_v8, 1.0 }
  0x2e   : > { %1430 = vrcp.f32 %v636_v15 }
  0x2f   : > { %1432 = vlog2.f32 %v636_v15 }
  0x30   : > { %1434 = vrcp.f32 %v827_v40 }
  0x31   : > { %1436 = vlog2.f32 %v827_v40 }
  0x35   : > { %v1419_v31 = vpop.eup %1418 }
  0x36   : > { %v1421_v36 = vpop.eup %1420  ;;  %v649_v37 = vmul.f32 %v1419_v31, %v645_v23 }
  0x37   : > { %v1423_v42 = vpop.eup %1422  ;;  %v650_v43 = vmul.f32 %v1421_v36, %v646_v29 }
  0x38   : > { %v1425_v47 = vpop.eup %1424  ;;  %v651_v48 = vmul.f32 %v1423_v42, %v647_v32  ;;  %v653_v49 = vmax.f32 %v649_v37, 0.0001 }
  0x39   : > { %v1427_v51 = vpop.eup %1426  ;;  %v654_v54 = vmax.f32 %v650_v43, 0.0001  ;;  %v666_v55 = vmul.f32 0.6931472, %v1425_v47 }
  0x3a   : > { %v1429_v56 = vpop.eup %1428  ;;  %v655_v57 = vmax.f32 %v651_v48, 0.0001  ;;  %v657_v58 = vmin.f32 %v653_v49, 0.9999  ;;  %v668_v59 = vmul.f32 0.6931472, %v1427_v51 }
  0x3b   : > { %v658_v60 = vmin.f32 %v654_v54, 0.9999  ;;  %v670_v61 = vmul.f32 0.6931472, %v1429_v56  ;;  %v673_v62 = vadd.f32 %v666_v55, %v661_v34  ;;  %v1431_v15 = vpop.eup %1430 }
  0x3c   : > { %v659_v63 = vmin.f32 %v655_v57, 0.9999  ;;  %v674_v1 = vadd.f32 %v668_v59, %v662_v35  ;;  %v693_v2 = vsub.f32 1.0, %v657_v58  ;;  %v721_v3 = vmul.f32 %v657_v58, %v657_v58  ;;  %v1433_v22 = vpop.eup %1432 }
  0x3d   : > { %v675_v4 = vadd.f32 %v670_v61, %v663_v38  ;;  %v677_v5 = vsub.f32 0.0, %v673_v62  ;;  %v685_v11 = vsub.f32 %v1566_v10, %v673_v62  ;;  %v694_v14 = vsub.f32 1.0, %v658_v60 }
  0x3e   : > { %v678_v16 = vsub.f32 0.0, %v674_v1  ;;  %v686_v19 = vsub.f32 %v1574_v12, %v674_v1  ;;  %v695_v20 = vsub.f32 1.0, %v659_v63  ;;  %v697_v21 = vmul.f32 %v693_v2, %v693_v2  ;;  %v1435_v2 = vpop.eup %1434 }
  0x3f   : > { %v652_v23 = vmul.f32 %v1431_v15, %v648_v53  ;;  %v679_v24 = vsub.f32 0.0, %v675_v4  ;;  %v681_v25 = vmax.f32 %v677_v5, -9.2103405  ;;  %v687_v26 = vsub.f32 %v1577_v13, %v675_v4  ;;  %v1437_v5 = vpop.eup %1436 }
  0x40   : > { %v672_v29 = vmul.f32 0.6931472, %v1433_v22  ;;  %v682_v30 = vmax.f32 %v678_v16, -9.2103405  ;;  %v689_v31 = vmax.f32 %v685_v11, -9.2103405  ;;  %v698_v32 = vmul.f32 %v694_v14, %v694_v14 }
  0x41   : > { %v656_v34 = vmax.f32 %v652_v23, 0.0001  ;;  %v683_v35 = vmax.f32 %v679_v24, -9.2103405  ;;  %v690_v36 = vmax.f32 %v686_v19, -9.2103405  ;;  %v699_v37 = vmul.f32 %v695_v20, %v695_v20 }
  0x42   : > { %v676_v38 = vadd.f32 %v672_v29, %v664_v39  ;;  %v691_v40 = vmax.f32 %v687_v26, -9.2103405  ;;  %v701_v42 = vmul.f32 %v697_v21, %v689_v31  ;;  %v722_v43 = vmul.f32 %v658_v60, %v658_v60 }
  0x43   : > { %v660_v47 = vmin.f32 %v656_v34, 0.9999  ;;  %v702_v48 = vmul.f32 %v698_v32, %v690_v36  ;;  %v723_v49 = vmul.f32 %v659_v63, %v659_v63  ;;  %v725_v51 = vmul.f32 %v721_v3, %v681_v25 }
  0x44   : > { %v680_v54 = vsub.f32 0.0, %v676_v38  ;;  %v688_v55 = vsub.f32 %v1607_v41, %v676_v38  ;;  %v703_v56 = vmul.f32 %v699_v37, %v691_v40  ;;  %v726_v39 = vmul.f32 %v722_v43, %v682_v30 }
  0x45   : > { %v696_v10 = vsub.f32 1.0, %v660_v47  ;;  %v724_v58 = vmul.f32 %v660_v47, %v660_v47  ;;  %v727_v59 = vmul.f32 %v723_v49, %v683_v35  ;;  %v729_v60 = vmul.f32 %v725_v51, %v1626_v44 }
  0x46   : > { %v684_v12 = vmax.f32 %v680_v54, -9.2103405  ;;  %v692_v62 = vmax.f32 %v688_v55, -9.2103405  ;;  %v730_v63 = vmul.f32 %v726_v39, %v1628_v45  ;;  %v789_v1 = vsel %vm1661_vm3, %v725_v51, 0.0 }
  0x47   : > { %v700_v3 = vmul.f32 %v696_v10, %v696_v10  ;;  %v731_v4 = vmul.f32 %v727_v59, %v1630_v46  ;;  %v741_v13 = vsel %vm737_vm5, %v729_v60, 0.0  ;;  %v790_v44 = vsel %vm1670_vm4, %v726_v39, 0.0  ;;  %v856_v51 = vld [vmem:[#allocation4 + $0x10] sm:$0x3]  ;;  %v857_v55 = vld [vmem:[#allocation4] sm:$0x3] }
  0x48   : > { %v728_v11 = vmul.f32 %v724_v58, %v684_v12  ;;  %v742_v14 = vsel %vm738_vm6, %v730_v63, 0.0  ;;  %v745_v45 = vsel %vm733_vm0, %v701_v42, %v741_v13  ;;  %v791_v15 = vsel %vm1679_vm10, %v727_v59, 0.0  ;;  %vm1708_vm0 = vmand %vm756_vm8, %vm760_vm9  ;;  %v859_v59 = vld [vmem:[#allocation4 + $0x8] sm:$0x3] }
  0x49   : > { %v704_v16 = vmul.f32 %v700_v3, %v692_v62  ;;  %v743_v46 = vsel %vm739_vm7, %v731_v4, 0.0  ;;  %v746_v19 = vsel %vm734_vm1, %v702_v48, %v742_v14  ;;  %v1004_v20 = vadd.f32 %v790_v44, %v789_v1 }
  0x4a   : > { %v732_v21 = vmul.f32 %v728_v11, %v1632_v50  ;;  %v747_v22 = vsel %vm735_vm2, %v703_v56, %v743_v46  ;;  %v931_v23 = vadd.f32 %v746_v19, %v745_v45  ;;  %v831_v24 = vmul.f32 %v1435_v2, %v1638_v52  ;;  %v858_v56 = vld [vmem:[#allocation4 + $0x18] sm:$0x3] }
  0x4b   : > { %v836_v25 = vmul.f32 0.6931472, %v1437_v5  ;;  %vm1801_vm1 = vcmp.lt.f32.partialorder %v1561_v9, 1.0  ;;  %v1005_v26 = vadd.f32 %v1004_v20, %v791_v15  ;;  %vm1802_vm2 = vcmp.eq.f32.partialorder %v1561_v9, 1.0 }
  0x4c   : > { %v744_v8 = vsel %vm1801_vm1, %v732_v21, 0.0  ;;  %v932_v50 = vadd.f32 %v931_v23, %v747_v22  ;;  %v792_v29 = vsel %vm1708_vm0, %v728_v11, 0.0  ;;  %v832_v30 = vmax.f32 %v831_v24, 0.0001 }
  0x4d   : > { %v748_v41 = vsel %vm1802_vm2, %v704_v16, %v744_v8  ;;  %v837_v52 = vadd.f32 %v836_v25, %v834_v27  ;;  %v847_v35 = vmul.f32 %v846_v7, %v846_v7  ;;  %v1006_v36 = vadd.f32 %v1005_v26, %v792_v29 }
  0x4e   : > { %v933_v31 = vadd.f32 %v932_v50, %v748_v41  ;;  %v833_v32 = vmin.f32 %v832_v30, 0.9999  ;;  %v806_v1 = vsel %vm1670_vm4, 1.0, %v1462_v0  ;;  %v807_v13 = vsel %vm1679_vm10, 1.0, %v1462_v0 }
  0x4f   : > { %v838_v34 = vsub.f32 0.0, %v837_v52  ;;  %v840_v28 = vsub.f32 %v1603_v33, %v837_v52  ;;  %v1022_v2 = vadd.f32 %v806_v1, %v805_v17  ;;  %v808_v53 = vsel %vm1708_vm0, 1.0, %v1462_v0 }
  0x50   : > { %934 = vadd.xlane.f32.xlu0 %v933_v31  ;;  %v842_v40 = vsub.f32 1.0, %v833_v32  ;;  %v848_v9 = vmul.f32 %v833_v32, %v833_v32  ;;  %vm944_vm3 = vcmask 0  }
  0x51   : > { %v839_v37 = vmax.f32 %v838_v34, -9.2103405  ;;  %v841_v38 = vmax.f32 %v840_v28, -9.2103405  ;;  %v1023_v14 = vadd.f32 %v1022_v2, %v807_v13 }
  0x52   : > { %v843_v42 = vmul.f32 %v842_v40, %v842_v40 }
  0x53   : > { %v849_v43 = vmul.f32 %v848_v9, %v839_v37  ;;  %v1024_v57 = vadd.f32 %v1023_v14, %v808_v53 }
  0x54   : > { %1007 = vadd.xlane.f32.xlu0 %v1006_v36  ;;  %v844_v47 = vmul.f32 %v843_v42, %v841_v38 }
  0x55   : > { %v850_v48 = vmul.f32 %v849_v43, %v847_v35 }
  0x57   : > { %v853_v27 = vsel %vm852_vm11, %v850_v48, 0.0 }
  0x58   : > { %v854_v49 = vsel %vm1803_vm12, %v844_v47, %v853_v27 }
  0x59   : > { %v861_v33 = vcombine.high %v854_v49, %v854_v49  ;;  %v868_v54 = vrot.slane %v854_v49, %v1588_v18 }
  0x5b   : > { %v875_v39 = vrot.slane %v861_v33, %v1588_v18  ;;  %v876_v10 = vcombine.high %v868_v54, %v868_v54  ;;  %v882_v58 = vadd.f32 %v868_v54, %v856_v51 }
  0x5d   : > { %v877_v60 = vcombine.high %v875_v39, %v875_v39  ;;  %v883_v12 = vadd.f32 %v876_v10, %v857_v55  ;;  %v884_v62 = vadd.f32 %v875_v39, %v858_v56  ;;  %886 = vst [vmem:[#allocation4 + $0x10] sm:$0x3] %v882_v58 }
  0x5f   : > { %v885_v63 = vadd.f32 %v877_v60, %v859_v59  ;;  %887 = vst [vmem:[#allocation4] sm:$0x3] %v883_v12  ;;  %888 = vst [vmem:[#allocation4 + $0x18] sm:$0x3] %v884_v62 }
  0x61   : > { %889 = vst [vmem:[#allocation4 + $0x8] sm:$0x3] %v885_v63 }
  0x64   : > { %v964_v18 = vld [vmem:[#allocation4 + $0x10] sm:$0xff] }
  0x66   : > { %v965_v3 = vld [vmem:[#allocation4] sm:$0xff]  ;;  %v966_v4 = vld [vmem:[#allocation4 + $0x18] sm:$0xff] }
  0x67   : > { %v968_v44 = vadd.f32 %v965_v3, %v964_v18 }
  0x68   : > { %v967_v5 = vld [vmem:[#allocation4 + $0x8] sm:$0xff] }
  0x69   : > { %v969_v11 = vadd.f32 %v968_v44, %v966_v4 }
  0x6b   : > { %v970_v45 = vadd.f32 %v969_v11, %v967_v5 }
  0x6d   : > { %971 = vadd.xlane.f32.xlu1 %v970_v45 }
  0x71   : > { %1025 = vadd.xlane.f32.xlu1 %v1024_v57 }
  0xa2   : > { %v954_v15 = vpop.xlane.xlu0 %953 }
  0xa3   : > { %v955_v16 = vrot.slane %v954_v15, 4 }
  0xa5   : > { %v956_v46 = vadd.f32 %v955_v16, %v954_v15 }
  0xa7   : > { %v957_v19 = vrot.slane %v956_v46, 2 }
  0xa9   : > { %v958_v61 = vadd.f32 %v957_v19, %v956_v46 }
  0xab   : > { %v959_v24 = vrot.slane %v958_v61, 1 }
  0xad   : > { %v960_v8 = vadd.f32 %v959_v24, %v958_v61 }
  0xb3   : > { %v990_v0 = vpop.xlane.xlu1 %989 }
  0xb4   : > { %v991_v26 = vrot.slane %v990_v0, 4 }
  0xb6   : > { %v992_v29 = vadd.f32 %v991_v26, %v990_v0 }
  0xb8   : > { %v993_v52 = vrot.slane %v992_v29, 2 }
  0xba   : > { %v994_v36 = vadd.f32 %v993_v52, %v992_v29 }
  0xbc   : > { %v995_v43 = vrot.slane %v994_v36, 1 }
  0xbe   : > { %v996_v33 = vadd.f32 %v995_v43, %v994_v36 }
  0xd9   : > { %v935_v20 = vpop.xlane.xlu0 %934 }
  0xda   : > { %v936_v21 = vrot.slane %v935_v20, 4 }
  0xdc   : > { %v937_v22 = vadd.f32 %v936_v21, %v935_v20 }
  0xdd   : > { %v1008_v6 = vpop.xlane.xlu0 %1007 }
  0xde   : > { %v938_v23 = vrot.slane %v937_v22, 2  ;;  %v1009_v41 = vrot.slane %v1008_v6, 4 }
  0xe0   : > { %v939_v25 = vadd.f32 %v938_v23, %v937_v22  ;;  %v1010_v30 = vadd.f32 %v1009_v41, %v1008_v6 }
  0xe2   : > { %v940_v7 = vrot.slane %v939_v25, 1  ;;  %v1011_v32 = vrot.slane %v1010_v30, 2 }
  0xe4   : > { %v941_v50 = vadd.f32 %v940_v7, %v939_v25  ;;  %v1012_v37 = vadd.f32 %v1011_v32, %v1010_v30 }
  0xe6   : > { %1370 = vpush %v941_v50  ;;  %v1013_v27 = vrot.slane %v1012_v37, 1 }
  0xe7   : > { %1372 = vpush %v960_v8 }
  0xe8   : > { %v1014_v54 = vadd.f32 %v1013_v27, %v1012_v37 }
  0xf6   : > { %v972_v31 = vpop.xlane.xlu1 %971 }
  0xf7   : > { %v973_v34 = vrot.slane %v972_v31, 4 }
  0xf9   : > { %v974_v28 = vadd.f32 %v973_v34, %v972_v31 }
  0xfa   : > { %v1026_v35 = vpop.xlane.xlu1 %1025 }
  0xfb   : > { %v975_v38 = vrot.slane %v974_v28, 2  ;;  %v1027_v40 = vrot.slane %v1026_v35, 4 }
  0xfd   : > { %v1028_v9 = vadd.f32 %v1027_v40, %v1026_v35  ;;  %v976_v42 = vadd.f32 %v975_v38, %v974_v28 }
  0xff   : > { %v1029_v47 = vrot.slane %v1028_v9, 2  ;;  %v977_v48 = vrot.slane %v976_v42, 1 }
 0x101   : > { %v1030_v49 = vadd.f32 %v1029_v47, %v1028_v9  ;;  %v978_v51 = vadd.f32 %v977_v48, %v976_v42 }
 0x103   : > { %1374 = vpush %v978_v51  ;;  %v1031_v55 = vrot.slane %v1030_v49, 1 }
 0x104   : > { %1376 = vpush %v996_v33 }
 0x105   : > { %1378 = vpush %v1014_v54  ;;  %v1032_v56 = vadd.f32 %v1031_v55, %v1030_v49 }
 0x107   : > { %1380 = vpush %v1032_v56 }
 0x117   : > { %s1371_s13 = spop %1370 }
 0x118   : > { %v943_v39 = vstv %s1371_s13  ;;  %s1373_s17 = spop %1372 }
 0x119   : > { %945 = vst.msk [vmem:[%s550_s29] sm:$0x1] %vm944_vm3, %v943_v39  ;;  %v962_v10 = vstv %s1373_s17 }
 0x11a   : > { %963 = vst.msk [vmem:[%s556_s16] sm:$0x1] %vm944_vm3, %v962_v10 }
 0x134   : > { %s1375_s21 = spop %1374 }
 0x135   : > { %v980_v58 = vstv %s1375_s21  ;;  %s1377_s25 = spop %1376 }
 0x136   : > { %981 = vst.msk [vmem:[%s562_s20] sm:$0x1] %vm944_vm3, %v980_v58  ;;  %v998_v59 = vstv %s1377_s25  ;;  %s1379_s29 = spop %1378 }
 0x137   : > { %999 = vst.msk [vmem:[%s568_s24] sm:$0x1] %vm944_vm3, %v998_v59  ;;  %v1016_v60 = vstv %s1379_s29 }
 0x138   : > { %1017 = vst.msk [vmem:[%s574_s28] sm:$0x1] %vm944_vm3, %v1016_v60  ;;  %s1381_s16 = spop %1380 }
 0x139   : > { %v1034_v12 = vstv %s1381_s16 }
 0x13a   : > { %1035 = vst.msk [vmem:[%s580_s15] sm:$0x1] %vm944_vm3, %v1034_v12 }
 0x13b PF: > { %s20_s11 = sadd.s32 1, %s1460_s11   ;;  %s1804_s30 = smov %s1456_s10 }
 0x13c   : > { %p17_p5 = scmp.ge.s32.totalorder %s20_s11, 4   ;;  %s1805_s10 = smov %s1807_s12 }
 0x13e   :  { %19 = sbr.rel (!%p17_p5) target bundleno = 2 (0x2), region = 143 }

</bundles_post_ra>
